<compile_context>
chip_gen: v5e
topology: v5e:2x2
jax: 0.10.0
libtpu: 0.0.40
codegen_flags: <defaults>
</compile_context>

<pallas_src>
import functools

import jax
import jax.numpy as jnp
from jax import lax
from jax.experimental import pallas as pl
from jax.experimental.pallas import tpu as pltpu


def _round_up(a, b):
    return ((a + b - 1) // b) * b


def _default_use_bf16():
    # bf16 VPU/EUP exists on v6e/v7x; v5e and older emulate bf16 elementwise
    # (slow), so keep the f32 path there.
    try:
        kind = jax.devices()[0].device_kind.lower()
    except Exception:
        return False
    return any(tag in kind for tag in ("v6", "v7", "7x"))


def _vmem_budget_bytes():
    # Generation-aware cap: ~60% of physical VMEM, leaving headroom for
    # compiler-internal scratch (v7x: ~38 MiB of 64; v5e/v6e: ~76 MiB of 128).
    try:
        cap = int(getattr(pltpu.get_tpu_info(), "vmem_capacity_bytes", 64 << 20))
    except Exception:
        cap = 64 << 20
    return int(cap * 0.6)


# ----------------------------------------------------------------------------
# Pallas kernel: one (batch, query-tile) step of the attention hot path
# ----------------------------------------------------------------------------
def _attention_kernel(xq_ref, g_ref, hv_ref, wf_ref, bf_ref, bv_ref, gamma_ref,
                      o_ref, *, nc, hw_valid, use_bf16):
    mm_dtype = jnp.bfloat16 if use_bf16 else jnp.float32

    xq = xq_ref[0]                        # (C, TQ)    f32 query tile (+ residual)
    g = g_ref[0]                          # (Hd, HWp)  hoisted g projection
    hv = hv_ref[0]                        # (C+1, HWp) [wv@wh-projected values ; ones]

    # f projection of the query tile (1x1 conv == channel-contraction matmul).
    f = lax.dot_general(wf_ref[...], xq, (((1,), (0,)), ((), ())),
                        preferred_element_type=jnp.float32) + bf_ref[...]   # (Hd, TQ)

    # Scores: s[i, j] = sum_c f[c, i] * g[c, j]  -> (TQ, HWp), f32 accumulation.
    s = lax.dot_general(f.astype(mm_dtype), g, (((0,), (0,)), ((), ())),
                        preferred_element_type=jnp.float32)

    # Mask padded key columns (branch only emitted when HW was zero-padded).
    if s.shape[-1] != hw_valid:
        col = lax.broadcasted_iota(jnp.int32, (1, s.shape[-1]), 1)
        s = jnp.where(col < hw_valid, s, jnp.float32(-1e30))

    # Softmax numerator on the EUP (bf16 exp on the v6e/v7x path, f32 on v5e).
    m = jnp.max(s, axis=-1, keepdims=True)
    e = jnp.exp((s - m).astype(mm_dtype))                                   # (TQ, HWp)

    # Fused PV matmul: the appended ones row of hv makes the last output row the
    # softmax row-sum l, so one MXU matmul (f32 accumulation) yields both the
    # (C, TQ) unnormalized output and the (1, TQ) normalizer.
    v_aug = lax.dot_general(hv, e, (((1,), (1,)), ((), ())),
                            preferred_element_type=jnp.float32)             # (C+1, TQ)
    v_un = v_aug[:nc]                                                        # (C, TQ)
    l = v_aug[nc:]                                                           # (1, TQ)

    # Deferred softmax normalization: O(C*TQ) scale instead of O(TQ*HW) divide.
    v = v_un * pl.reciprocal(l, approx=use_bf16) + bv_ref[...]               # (C, TQ)

    o_ref[0] = gamma_ref[0] * v + xq


# ----------------------------------------------------------------------------
# Wrapper: reshape/pad glue, trace-time weight fusion, hoisted projections
# ----------------------------------------------------------------------------
def attention_forward(x_nchw, params, *, tq=256, use_bf16=None):
    nb, nc, imgh, imgw = x_nchw.shape
    hw = imgh * imgw
    hid = params["wf"].shape[0]

    if use_bf16 is None:
        use_bf16 = _default_use_bf16()
    mm_dtype = jnp.bfloat16 if use_bf16 else jnp.float32
    in_item = 2 if use_bf16 else 4

    vmem_cap = _vmem_budget_bytes()

    # Query-tile size: lane-dense multiple of 128; HW padded up to a multiple
    # of TQ so the flash tiling works for arbitrary (non-128-aligned) images.
    hw128 = _round_up(hw, 128)
    tq = max(128, (min(tq, hw128) // 128) * 128)
    while tq > 128 and tq * hw128 * (4 + in_item) > vmem_cap // 2:
        tq = max(128, ((tq // 2) // 128) * 128)
    hw_pad = _round_up(hw128, tq)
    nq = hw_pad // tq

    # NCHW -> (nb, C, HW): pure reshape, HW stays the lane-dense last dim.
    x_flat = x_nchw.reshape(nb, nc, hw).astype(jnp.float32)
    if hw_pad != hw:
        x_flat = jnp.pad(x_flat, ((0, 0), (0, 0), (0, hw_pad - hw)))

    # Hoisted key/value projections (once per image, outside the q loop):
    #   g      = wg @ x + bg                        (nb, Hd,  HWp)
    #   hv     = (wv @ wh) @ x + wv @ bh            (nb, C,   HWp)  [wv folded]
    #   hv_aug = [hv ; ones]                        (nb, C+1, HWp)
    g_p = jnp.einsum("oc,bcn->bon", params["wg"], x_flat) + params["bg"][None]
    whv = params["wv"] @ params["wh"]
    bhv = params["wv"] @ params["bh"]
    hv = jnp.einsum("oc,bcn->bon", whv, x_flat) + bhv[None]
    hv_aug = jnp.concatenate([hv, jnp.ones((nb, 1, hw_pad), jnp.float32)], axis=1)
    g_p = g_p.astype(mm_dtype)
    hv_aug = hv_aug.astype(mm_dtype)

    gamma = params["gamma"].reshape(1).astype(jnp.float32)

    vmem_estimate = (
        tq * hw_pad * 4                               # s (f32)
        + tq * hw_pad * in_item                       # e
        + 2 * (hid + nc + 1) * hw_pad * in_item       # g + hv blocks (dbl-buffered)
        + 2 * 2 * nc * tq * 4                         # xq + out tiles (dbl-buffered)
        + (2 << 20)                                   # weights, temps, slack
    )
    vmem_limit = int(min(max(vmem_estimate, 16 << 20), vmem_cap))

    kernel = functools.partial(_attention_kernel, nc=nc, hw_valid=hw,
                               use_bf16=use_bf16)
    wmap = lambda b, q: (0, 0)

    out_flat = pl.pallas_call(
        kernel,
        out_shape=jax.ShapeDtypeStruct((nb, nc, hw_pad), jnp.float32),
        grid_spec=pltpu.PrefetchScalarGridSpec(
            num_scalar_prefetch=0,
            grid=(nb, nq),
            in_specs=[
                pl.BlockSpec((1, nc, tq), lambda b, q: (b, 0, q)),          # x query tile
                pl.BlockSpec((1, hid, hw_pad), lambda b, q: (b, 0, 0)),     # g (keys)
                pl.BlockSpec((1, nc + 1, hw_pad), lambda b, q: (b, 0, 0)),  # hv_aug (values)
                pl.BlockSpec((hid, nc), wmap),                              # wf
                pl.BlockSpec((hid, 1), wmap),                               # bf
                pl.BlockSpec((nc, 1), wmap),                                # bv
                pl.BlockSpec(memory_space=pltpu.MemorySpace.SMEM),          # gamma scalar
            ],
            out_specs=pl.BlockSpec((1, nc, tq), lambda b, q: (b, 0, q)),
        ),
        compiler_params=pltpu.CompilerParams(
            dimension_semantics=("parallel", "parallel"),
            vmem_limit_bytes=vmem_limit),
    )(x_flat, g_p, hv_aug, params["wf"], params["bf"], params["bv"], gamma)

    if hw_pad != hw:
        out_flat = out_flat[:, :, :hw]
    return out_flat.reshape(nb, nc, imgh, imgw)


# ----------------------------------------------------------------------------
# Pure-JAX reference (mirrors the PyTorch forward exactly) for validation
# ----------------------------------------------------------------------------
def attention_reference(x_nchw, params):
    nb, nc, imgh, imgw = x_nchw.shape
    hw = imgh * imgw
    xf = x_nchw.reshape(nb, nc, hw)                                        # (nb, C, HW)
    f = jnp.einsum("oc,bcn->bon", params["wf"], xf) + params["bf"][None]   # (nb, Hd, HW)
    g = jnp.einsum("oc,bcn->bon", params["wg"], xf) + params["bg"][None]
    h = jnp.einsum("oc,bcn->bon", params["wh"], xf) + params["bh"][None]
    s = jnp.einsum("bci,bcj->bij", f, g)                                   # f^T g
    beta = jax.nn.softmax(s, axis=-1)
    o = jnp.einsum("bij,bcj->bic", beta, h)                                # beta @ h^T
    v = jnp.einsum("oc,bic->boi", params["wv"], o) + params["bv"][None]    # (nb, C, HW)
    out = params["gamma"][0] * v + xf
    return out.reshape(nb, nc, imgh, imgw)


# ----------------------------------------------------------------------------
# Deterministic parameter init (spectral-norm'd 1x1 convs + gamma)
# ----------------------------------------------------------------------------
def _spectral_normalize(w2d):
    # spectral_norm divides the (out, in) weight by its largest singular value.
    # PyTorch estimates sigma with power iteration; we use the exact SVD value.
    sigma = jnp.linalg.svd(w2d, compute_uv=False)[0]
    return w2d / sigma


def init_params(key, channels, hidden_channels):
    ks = jax.random.split(key, 8)

    def conv_init(kw, kb, c_in, c_out):
        bound = 1.0 / jnp.sqrt(c_in)  # 1x1 conv: fan_in = c_in
        w = jax.random.uniform(kw, (c_out, c_in), jnp.float32, -bound, bound)
        b = jax.random.uniform(kb, (c_out,), jnp.float32, -bound, bound)
        w = _spectral_normalize(w)
        # conv orientation (out, in); biases as (out, 1) column for broadcasting.
        return w, b.reshape(c_out, 1)

    wf, bf = conv_init(ks[0], ks[1], channels, hidden_channels)
    wg, bg = conv_init(ks[2], ks[3], channels, hidden_channels)
    wh, bh = conv_init(ks[4], ks[5], channels, hidden_channels)
    wv, bv = conv_init(ks[6], ks[7], hidden_channels, channels)
    return {
        "wf": wf, "bf": bf,
        "wg": wg, "bg": bg,
        "wh": wh, "bh": bh,
        "wv": wv, "bv": bv,
        # module init is gamma = 0.0 (output == x); kept faithful here.
        "gamma": jnp.zeros((1,), jnp.float32),
    }


if __name__ == "__main__":
    key = jax.random.PRNGKey(0)
    batch, channels, hidden_channels, spatial = 2, 4, 8, 16

    kx, kp = jax.random.split(key)
    x = jax.random.normal(kx, (batch, channels, spatial, spatial), jnp.float32)
    params = init_params(kp, channels, hidden_channels)

    # Faithful run (gamma = 0.0, as in the module's __init__) on the f32 path.
    out = jax.block_until_ready(attention_forward(x, params, use_bf16=False))
    ref = attention_reference(x, params)
    assert jnp.allclose(out, ref, atol=1e-5, rtol=1e-5)

    # Non-zero gamma so the attention path is numerically exercised (f32 path).
    params_nz = dict(params, gamma=jnp.full((1,), 0.5, jnp.float32))
    out_nz = jax.block_until_ready(attention_forward(x, params_nz, use_bf16=False))
    ref_nz = attention_reference(x, params_nz)
    assert jnp.allclose(out_nz, ref_nz, atol=1e-4, rtol=1e-4)

    # Non-128-aligned spatial size: exercises the HW padding + key-mask path.
    x_odd = jax.random.normal(jax.random.PRNGKey(1),
                              (batch, channels, 12, 12), jnp.float32)
    out_odd = jax.block_until_ready(attention_forward(x_odd, params_nz,
                                                      use_bf16=False))
    ref_odd = attention_reference(x_odd, params_nz)
    assert jnp.allclose(out_odd, ref_odd, atol=1e-4, rtol=1e-4)

    # bf16 MXU/EUP fast path (v6e/v7x default): f32 accumulation, loose check.
    out_bf16 = jax.block_until_ready(attention_forward(x, params_nz, use_bf16=True))
    assert bool(jnp.all(jnp.isfinite(out_bf16)))
    assert float(jnp.max(jnp.abs(out_bf16 - ref_nz))) < 0.5

    print("KERNEL_OK")
</pallas_src>

<mosaic_0001>
module attributes {stable_mosaic.version = 11 : i64} {
  func.func @_attention_kernel(%arg0: i32, %arg1: i32, %arg2: memref<1x4x256xf32, #tpu.memory_space<vmem>>, %arg3: memref<1x8x256xf32, #tpu.memory_space<vmem>>, %arg4: memref<1x5x256xf32, #tpu.memory_space<vmem>>, %arg5: memref<8x4xf32, #tpu.memory_space<vmem>>, %arg6: memref<8x1xf32, #tpu.memory_space<vmem>>, %arg7: memref<4x1xf32, #tpu.memory_space<vmem>>, %arg8: memref<1xf32, #tpu.memory_space<smem>>, %arg9: memref<1x4x256xf32, #tpu.memory_space<vmem>>) attributes {dimension_semantics = [#tpu.dimension_semantics<parallel>, #tpu.dimension_semantics<parallel>], iteration_bounds = array<i64: 2, 1>, scalar_prefetch = 0 : i64, scratch_operands = 0 : i64, tpu.core_type = #tpu.core_type<tc>, window_params = [{transform_indices = @transform_0, window_bounds = array<i64: 1, 4, 256>}, {transform_indices = @transform_1, window_bounds = array<i64: 1, 8, 256>}, {transform_indices = @transform_2, window_bounds = array<i64: 1, 5, 256>}, {pipeline_mode = #tpu.pipeline_mode<synchronous>, transform_indices = @transform_3, window_bounds = array<i64: 8, 4>}, {pipeline_mode = #tpu.pipeline_mode<synchronous>, transform_indices = @transform_4, window_bounds = array<i64: 8, 1>}, {pipeline_mode = #tpu.pipeline_mode<synchronous>, transform_indices = @transform_5, window_bounds = array<i64: 4, 1>}, {transform_indices = @transform_6, window_bounds = array<i64: 1>}, {transform_indices = @transform_7, window_bounds = array<i64: 1, 4, 256>}]} {
    %c0 = arith.constant 0 : index
    %c0_0 = arith.constant 0 : index
    %c0_1 = arith.constant 0 : index
    %0 = vector.load %arg2[%c0, %c0_0, %c0_1] : memref<1x4x256xf32, #tpu.memory_space<vmem>>, vector<1x4x256xf32>
    %1 = vector.shape_cast %0 : vector<1x4x256xf32> to vector<4x256xf32>
    %c0_2 = arith.constant 0 : index
    %c0_3 = arith.constant 0 : index
    %c0_4 = arith.constant 0 : index
    %2 = vector.load %arg3[%c0_2, %c0_3, %c0_4] : memref<1x8x256xf32, #tpu.memory_space<vmem>>, vector<1x8x256xf32>
    %3 = vector.shape_cast %2 : vector<1x8x256xf32> to vector<8x256xf32>
    %c0_5 = arith.constant 0 : index
    %c0_6 = arith.constant 0 : index
    %c0_7 = arith.constant 0 : index
    %4 = vector.load %arg4[%c0_5, %c0_6, %c0_7] : memref<1x5x256xf32, #tpu.memory_space<vmem>>, vector<1x5x256xf32>
    %5 = vector.shape_cast %4 : vector<1x5x256xf32> to vector<5x256xf32>
    %c0_8 = arith.constant 0 : index
    %c0_9 = arith.constant 0 : index
    %6 = vector.load %arg5[%c0_8, %c0_9] : memref<8x4xf32, #tpu.memory_space<vmem>>, vector<8x4xf32>
    %cst = arith.constant dense<0.000000e+00> : vector<8x256xf32>
    %7 = tpu.matmul %6, %1, %cst {dimension_numbers = #tpu.dot_dimension_numbers<[1], [0], [0], [1], [0, 0, 1, 1], [], []>} : vector<8x4xf32>, vector<4x256xf32>, vector<8x256xf32> -> vector<8x256xf32>
    %c0_10 = arith.constant 0 : index
    %c0_11 = arith.constant 0 : index
    %8 = vector.load %arg6[%c0_10, %c0_11] : memref<8x1xf32, #tpu.memory_space<vmem>>, vector<8x1xf32>
    %9 = vector.broadcast %8 : vector<8x1xf32> to vector<8x256xf32>
    %10 = arith.addf %7, %9 : vector<8x256xf32>
    %cst_12 = arith.constant dense<0.000000e+00> : vector<256x256xf32>
    %11 = tpu.matmul %10, %3, %cst_12 {dimension_numbers = #tpu.dot_dimension_numbers<[0], [0], [1], [1], [0, 1, 1, 1], [], []>} : vector<8x256xf32>, vector<8x256xf32>, vector<256x256xf32> -> vector<256x256xf32>
    %cst_13 = arith.constant dense<0xFF800000> : vector<256xf32>
    %12 = vector.multi_reduction <maximumf>, %11, %cst_13 [1] : vector<256x256xf32> to vector<256xf32>
    %13 = vector.shape_cast %12 : vector<256xf32> to vector<256x1xf32>
    %14 = vector.broadcast %13 : vector<256x1xf32> to vector<256x256xf32>
    %15 = arith.subf %11, %14 : vector<256x256xf32>
    %16 = math.exp %15 : vector<256x256xf32>
    %cst_14 = arith.constant dense<0.000000e+00> : vector<5x256xf32>
    %17 = tpu.matmul %5, %16, %cst_14 {dimension_numbers = #tpu.dot_dimension_numbers<[1], [1], [0], [0], [0, 0, 1, 0], [], []>} : vector<5x256xf32>, vector<256x256xf32>, vector<5x256xf32> -> vector<5x256xf32>
    %18 = vector.extract_strided_slice %17 {offsets = [0, 0], sizes = [4, 256], strides = [1, 1]} : vector<5x256xf32> to vector<4x256xf32>
    %19 = vector.extract_strided_slice %17 {offsets = [4, 0], sizes = [1, 256], strides = [1, 1]} : vector<5x256xf32> to vector<1x256xf32>
    %20 = tpu.reciprocal %19 : vector<1x256xf32> -> vector<1x256xf32>
    %21 = vector.broadcast %20 : vector<1x256xf32> to vector<4x256xf32>
    %22 = arith.mulf %18, %21 : vector<4x256xf32>
    %c0_15 = arith.constant 0 : index
    %c0_16 = arith.constant 0 : index
    %23 = vector.load %arg7[%c0_15, %c0_16] : memref<4x1xf32, #tpu.memory_space<vmem>>, vector<4x1xf32>
    %24 = vector.broadcast %23 : vector<4x1xf32> to vector<4x256xf32>
    %25 = arith.addf %22, %24 : vector<4x256xf32>
    %c0_17 = arith.constant 0 : index
    %26 = memref.load %arg8[%c0_17] : memref<1xf32, #tpu.memory_space<smem>>
    %27 = vector.broadcast %26 : f32 to vector<4x256xf32>
    %28 = arith.mulf %27, %25 : vector<4x256xf32>
    %29 = arith.addf %28, %1 : vector<4x256xf32>
    %c0_18 = arith.constant 0 : index
    %c0_19 = arith.constant 0 : index
    %c0_20 = arith.constant 0 : index
    %30 = vector.load %arg9[%c0_18, %c0_19, %c0_20] : memref<1x4x256xf32, #tpu.memory_space<vmem>>, vector<1x4x256xf32>
    %31 = vector.shape_cast %30 : vector<1x4x256xf32> to vector<4x256xf32>
    %32 = vector.shape_cast %29 : vector<4x256xf32> to vector<1x4x256xf32>
    tpu.vector_store %arg9[%c0_18, %c0_19, %c0_20], %32 {strides = array<i32>} : memref<1x4x256xf32, #tpu.memory_space<vmem>>, vector<1x4x256xf32>,
    return
  }
  func.func @transform_0(%arg0: i32, %arg1: i32) -> (i32, i32, i32) {
    %c0_i32 = arith.constant 0 : i32
    %c0_i32_0 = arith.constant 0 : i32
    return %arg0, %c0_i32, %arg1 : i32, i32, i32
  }
  func.func @transform_1(%arg0: i32, %arg1: i32) -> (i32, i32, i32) {
    %c0_i32 = arith.constant 0 : i32
    %c0_i32_0 = arith.constant 0 : i32
    %c0_i32_1 = arith.constant 0 : i32
    return %arg0, %c0_i32, %c0_i32_0 : i32, i32, i32
  }
  func.func @transform_2(%arg0: i32, %arg1: i32) -> (i32, i32, i32) {
    %c0_i32 = arith.constant 0 : i32
    %c0_i32_0 = arith.constant 0 : i32
    %c0_i32_1 = arith.constant 0 : i32
    return %arg0, %c0_i32, %c0_i32_0 : i32, i32, i32
  }
  func.func @transform_3(%arg0: i32, %arg1: i32) -> (i32, i32) {
    %c0_i32 = arith.constant 0 : i32
    %c0_i32_0 = arith.constant 0 : i32
    %c0_i32_1 = arith.constant 0 : i32
    return %c0_i32, %c0_i32_0 : i32, i32
  }
  func.func @transform_4(%arg0: i32, %arg1: i32) -> (i32, i32) {
    %c0_i32 = arith.constant 0 : i32
    %c0_i32_0 = arith.constant 0 : i32
    %c0_i32_1 = arith.constant 0 : i32
    return %c0_i32, %c0_i32_0 : i32, i32
  }
  func.func @transform_5(%arg0: i32, %arg1: i32) -> (i32, i32) {
    %c0_i32 = arith.constant 0 : i32
    %c0_i32_0 = arith.constant 0 : i32
    %c0_i32_1 = arith.constant 0 : i32
    return %c0_i32, %c0_i32_0 : i32, i32
  }
  func.func @transform_6(%arg0: i32, %arg1: i32) -> i32 {
    %c0_i32 = arith.constant 0 : i32
    %c0_i32_0 = arith.constant 0 : i32
    return %c0_i32 : i32
  }
  func.func @transform_7(%arg0: i32, %arg1: i32) -> (i32, i32, i32) {
    %c0_i32 = arith.constant 0 : i32
    %c0_i32_0 = arith.constant 0 : i32
    return %arg0, %c0_i32, %arg1 : i32, i32, i32
  }
}

</mosaic_0001>

<bundles_post_ra>
// kernel: tpu_custom_call.1
= control target key start
LH: loop header
LB: loop body
LE: loop exit
PB: predicated region body
PF: predicated region fallthrough
CT: control target
= control target key end

     0   :  { %s2242_s0 = inlined_call_operand.vmem [shape: f32[2,4,256], index: 0, kind: input, shape index: {}]   ;;  %s2243_s1 = inlined_call_operand.vmem [shape: f32[2,8,256], index: 1, kind: input, shape index: {}]   ;;  %s2244_s2 = inlined_call_operand.vmem [shape: f32[2,5,256], index: 2, kind: input, shape index: {}]   ;;  %s2245_s3 = inlined_call_operand.vmem [shape: f32[8,4], index: 3, kind: input, shape index: {}]   ;;  %s2246_s4 = inlined_call_operand.vmem [shape: f32[8,1], index: 4, kind: input, shape index: {}]   ;;  %s2247_s5 = inlined_call_operand.vmem [shape: f32[4,1], index: 5, kind: input, shape index: {}]   ;;  %s2248_s6 = inlined_call_operand.<no memory space> [shape: f32[1], index: 6, kind: input, shape index: {}]   ;;  %s2249_s7 = inlined_call_operand.hbm [shape: f32[2,4,256], index: 7, kind: output, shape index: {}]  }
   0x1   :  { %12 = sst [smem:[#allocation2]] %s2248_s6 }
   0x2   :  { %13 = vsyncpa [#allocation4], 0 }
   0x3   :  { %15 = vsyncpa [#allocation4 + $0x1], 0  ;;  %s1751_s26 = smov 0   ;;  %s1753_s27 = smov 0  }
   0x4   :  { %s1755_s28 = smov 0   ;;  %s1757_s29 = smov 0  }
   0x5   :  { %s1759_s30 = smov 0   ;;  %s1761_s8 = smov 0  }
   0x6 LB: > { %s1345_s6 = sadd.s32 4294967295, %s1705_s8   ;;  %s1346_s9 = sadd.s32 4294967294, %s1705_s8   ;;  %s1705_s8 = sphi %s1761_s8, %s21_s8   ;;  %s1701_s30 = sphi %s1759_s30, %s2283_s30   ;;  %s1697_s29 = sphi %s1757_s29, %s2282_s29   ;;  %s1693_s28 = sphi %s1755_s28, %s2281_s28   ;;  %s1689_s27 = sphi %s1753_s27, %s2280_s27   ;;  %s1685_s26 = sphi %s1751_s26, %s2279_s26  }
   0x7   : > { %s33_s10 = sadd.s32 1, %s1701_s30  ;;  %s206_s11 = sadd.s32 1, %s1693_s28 }
   0x8   : > { %p35_p0 = scmp.ge.s32.totalorder %s33_s10, 2  ;;  %p216_p1 = scmp.ne.s32.totalorder %s1693_s28, %s1689_s27 }
   0x9   : > { %p217_p2 = scmp.eq.s32.totalorder %s1345_s6, 1  ;;  %p222_p3 = scmp.ne.s32.totalorder %s1689_s27, %s1685_s26 }
   0xa   : > { %s2285_s10 = smov (%p35_p0, %s33_s10), 0  ;;  %p223_p5 = scmp.eq.s32.totalorder %s1346_s9, 1 }
   0xb   : > { %p1791_p4 = por %p217_p2, %p216_p1  ;;  %s201_s13 = ssub.s32 %s1701_s30, %s2285_s10 }
   0xc   : > { %p1349_p6 = scmp.ge.s32.totalorder %s1705_s8, 1  ;;  %p204_p7 = scmp.eq.s32.totalorder %s201_s13, 0 }
   0xd   : > { %p1798_p8 = por %p223_p5, %p222_p3  ;;  %p282_p9 = scmp.lt.s32.totalorder %s1705_s8, 3 }
   0xe   : > { %s1804_s15 = scalar_select %p204_p7, %s1693_s28, %s206_s11  }
   0xf   : > { %p283_p10 = pnand %p1349_p6, %p282_p9 }
  0x11   : > { %286 = sbr.rel (%p283_p10) target bundleno = 1213 (0x4bd), region = 48 }
  0x16   : > { %p329_p11 = scmp.lt.s32.totalorder %s1697_s29, 1  ;;  %v355_v0 = vld [vmem:[%s2246_s4] sm:$0xff]  ;;  %v1707_v1 = vmov 0   ;;  %vm369_vm0 = vcmask 1043456   ;;  %vm365_vm1 = vcmask 31744   ;;  %vm478_vm2 = vcmask 64512  }
  0x17   : > { %1493 = vset.pattern.permute.xlu0 %v1707_v1  ;;  %v354_v3 = vld [vmem:[%s2245_s3] sm:$0xff]  ;;  %s1209_s20 = sld [smem:[#allocation2]]  ;;  %s325_s21 = sand.u32 1, %s1689_s27  }
  0x18   : > { %s1811_s18 = scalar_select %p329_p11, %s1697_s29, 1  ;;  %358 = vperm.xlu0 %1493, %v355_v0  }
  0x19   : > { %s1433_s23 = sshll.u32 %s1697_s29, 3  ;;  %s1227_s29 = scalar_lea.sflag [#allocation4], %s325_s21 }
  0x1a   : > { %s1430_s19 = sshll.u32 %s1811_s18, 3  ;;  %s1431_s25 = sshll.u32 %s1811_s18, 4 }
  0x1b   : > { %s336_s22 = scalar_lea.vmem %s2242_s0, %s1430_s19  ;;  %s342_s11 = scalar_lea.vmem %s2243_s1, %s1431_s25 }
  0x1c   : > { %v349_v2 = vld [vmem:[%s336_s22] sm:$0xff]  ;;  %v351_v7 = vld [vmem:[%s342_s11 + $0x8] sm:$0xff]  ;;  %s347_s17 = scalar_lea.vmem %s2244_s2, %s1431_s25  ;;  %s1350_s22 = sshll.u32 %s325_s21, 3 }
  0x1d   : > { %362 = vst [vmem:[#allocation1] ss:$2 sm:$0xff] %v349_v2  ;;  %v350_v6 = vld [vmem:[%s342_s11] sm:$0xff]  ;;  %1435 = vmatpush.msra.mxu3 %v351_v7  ;;  %s1240_s6 = scalar_lea.hbm %s2249_s7, %s1433_s23  ;;  %s327_s9 = scalar_lea.vmem [#allocation3], %s1350_s22 }
  0x1e   : > { %1434 = vmatpush.msra.mxu2 %v350_v6  ;;  %s1242_s11 = sshll.u32 %s327_s9, 4  ;;  %s1244_s13 = sshll.u32 %s1240_s6, 4  ;;  %s1243_s11 = int_to_ptr.vmem [resolvable:$true] %s1242_s11  ;;  %s1245_s13 = int_to_ptr.hbm [resolvable:$true] %s1244_s13 }
  0x1f   : > { %s1641_s16 = sshra.s32 %s1245_s13, 4  ;;  %s1642_s16 = int_to_ptr.hbm [resolvable:$true] %s1641_s16 }
  0x20   : > { %p1648_p1 = scmp.lt.s32.totalorder %s1642_s16, %s2249_s7 }
  0x24   : > { %v363_v4 = vld.sshfl [vmem:[#allocation1] sm:$0xff pattern:$0x75316420]  ;;  %v364_v5 = vld.sshfl [vmem:[#allocation1 + $0x8] sm:$0xff pattern:$0x75316420] }
  0x25   : > { %1357 = vmatpush.msk.msra.mxu0 %vm369_vm0, %v363_v4  ;;  %1359 = vmatpush.msk.msra.mxu1 %vm369_vm0, %v364_v5  ;;  %1213 = vst [vmem:[#allocation1] ss:$2 sm:$0xff] %v349_v2 }
  0x26   : > { %1358 = vmatmul.msk.f32.vlgmr.msra.gmra.mxu0 %vm365_vm1, %v354_v3  ;;  %1360 = vmatmul.msk.f32.vlgmr.msra.gmra.mxu1 %vm365_vm1, %v354_v3 }
  0x27   : > { %590 = vmatpush.msrb.mxu0 %v350_v6  ;;  %703 = vmatpush.msrb.mxu1 %v351_v7 }
  0x8a   : > { %v359_v8 = vpop.permute.xlu0 %358 }
  0xa3   : > { %v391_v9 = vpop.f32.mrf.mxu0  ;;  %v411_v10 = vpop.f32.mrf.mxu1 }
  0xa4   : > { %v392_v11 = vadd.f32 %v391_v9, %v359_v8  ;;  %v412_v12 = vadd.f32 %v411_v10, %v359_v8 }
  0xa6   : > { %446 = vxpose.xlu1.b32.start.end [1/1] (short) %v412_v12, 128  ;;  %414 = vxpose.xlu0.b32.start.end [1/1] (short) %v392_v11, 128 }
  0xf9   : > { %1494 = vset.pattern.permute.xlu1 %v1707_v1 }
 0x14a   : > { %v430_v13 = vpop.trf.xlu0  ;;  %v462_v26 = vpop.trf.xlu1 }
 0x14b   : > { %1361 = vmatmul.msk.f32.vlgmr.msrb.gmra.mxu0 %vm478_vm2, %v430_v13  ;;  %1393 = vmatmul.msk.f32.vlgmr.msrb.gmra.mxu1 %vm478_vm2, %v430_v13 }
 0x152   : > { %v431_v14 = vpop.trf.xlu0  ;;  %v463_v28 = vpop.trf.xlu1 }
 0x153   : > { %1362 = vmatmul.msk.f32.gmra.mxu0 %vm478_vm2, %v431_v14  ;;  %1394 = vmatmul.msk.f32.gmra.mxu1 %vm478_vm2, %v431_v14 }
 0x15a   : > { %v432_v15 = vpop.trf.xlu0  ;;  %v464_v30 = vpop.trf.xlu1 }
 0x15b   : > { %1363 = vmatmul.msk.f32.gmra.mxu0 %vm478_vm2, %v432_v15  ;;  %1395 = vmatmul.msk.f32.gmra.mxu1 %vm478_vm2, %v432_v15 }
 0x162   : > { %v433_v16 = vpop.trf.xlu0  ;;  %v465_v32 = vpop.trf.xlu1 }
 0x163   : > { %1364 = vmatmul.msk.f32.gmra.mxu0 %vm478_vm2, %v433_v16  ;;  %1396 = vmatmul.msk.f32.gmra.mxu1 %vm478_vm2, %v433_v16 }
 0x16a   : > { %v434_v17 = vpop.trf.xlu0  ;;  %v466_v33 = vpop.trf.xlu1 }
 0x16b   : > { %1365 = vmatmul.msk.f32.gmra.mxu0 %vm478_vm2, %v434_v17  ;;  %1397 = vmatmul.msk.f32.gmra.mxu1 %vm478_vm2, %v434_v17 }
 0x172   : > { %v435_v18 = vpop.trf.xlu0  ;;  %v467_v34 = vpop.trf.xlu1 }
 0x173   : > { %1366 = vmatmul.msk.f32.gmra.mxu0 %vm478_vm2, %v435_v18  ;;  %1398 = vmatmul.msk.f32.gmra.mxu1 %vm478_vm2, %v435_v18 }
 0x17a   : > { %v436_v19 = vpop.trf.xlu0  ;;  %v468_v35 = vpop.trf.xlu1 }
 0x17b   : > { %1367 = vmatmul.msk.f32.gmra.mxu0 %vm478_vm2, %v436_v19  ;;  %1399 = vmatmul.msk.f32.gmra.mxu1 %vm478_vm2, %v436_v19 }
 0x182   : > { %v437_v20 = vpop.trf.xlu0  ;;  %v469_v36 = vpop.trf.xlu1 }
 0x183   : > { %1368 = vmatmul.msk.f32.gmra.mxu0 %vm478_vm2, %v437_v20  ;;  %1400 = vmatmul.msk.f32.gmra.mxu1 %vm478_vm2, %v437_v20 }
 0x18a   : > { %v438_v21 = vpop.trf.xlu0  ;;  %v470_v38 = vpop.trf.xlu1 }
 0x18b   : > { %1369 = vmatmul.msk.f32.gmra.mxu0 %vm478_vm2, %v438_v21  ;;  %1401 = vmatmul.msk.f32.gmra.mxu1 %vm478_vm2, %v438_v21 }
 0x192   : > { %v439_v22 = vpop.trf.xlu0  ;;  %v471_v40 = vpop.trf.xlu1 }
 0x193   : > { %1370 = vmatmul.msk.f32.vlgmr.msra.gmra.mxu2 %vm478_vm2, %v439_v22  ;;  %1402 = vmatmul.msk.f32.gmra.mxu1 %vm478_vm2, %v439_v22 }
 0x19a   : > { %v440_v23 = vpop.trf.xlu0  ;;  %v472_v42 = vpop.trf.xlu1 }
 0x19b   : > { %1371 = vmatmul.msk.f32.gmra.mxu2 %vm478_vm2, %v440_v23  ;;  %1403 = vmatmul.msk.f32.gmra.mxu1 %vm478_vm2, %v440_v23 }
 0x1a2   : > { %v441_v24 = vpop.trf.xlu0  ;;  %v473_v45 = vpop.trf.xlu1 }
 0x1a3   : > { %1372 = vmatmul.msk.f32.gmra.mxu2 %vm478_vm2, %v441_v24  ;;  %1404 = vmatmul.msk.f32.vlgmr.msra.gmra.mxu3 %vm478_vm2, %v441_v24 }
 0x1aa   : > { %v442_v25 = vpop.trf.xlu0  ;;  %v474_v48 = vpop.trf.xlu1 }
 0x1ab   : > { %1373 = vmatmul.msk.f32.gmra.mxu2 %vm478_vm2, %v442_v25  ;;  %1405 = vmatmul.msk.f32.gmra.mxu3 %vm478_vm2, %v442_v25 }
 0x1b2   : > { %v443_v27 = vpop.trf.xlu0  ;;  %v475_v54 = vpop.trf.xlu1 }
 0x1b3   : > { %1374 = vmatmul.msk.f32.gmra.mxu2 %vm478_vm2, %v443_v27  ;;  %1406 = vmatmul.msk.f32.gmra.mxu3 %vm478_vm2, %v443_v27 }
 0x1ba   : > { %v444_v29 = vpop.trf.xlu0  ;;  %v476_v22 = vpop.trf.xlu1 }
 0x1bb   : > { %1375 = vmatmul.msk.f32.gmra.mxu2 %vm478_vm2, %v444_v29  ;;  %1407 = vmatmul.msk.f32.gmra.mxu3 %vm478_vm2, %v444_v29 }
 0x1c2   : > { %v445_v31 = vpop.trf.xlu0 }
 0x1c3   : > { %1376 = vmatmul.msk.f32.gmra.mxu2 %vm478_vm2, %v445_v31  ;;  %1408 = vmatmul.msk.f32.gmra.mxu3 %vm478_vm2, %v445_v31 }
 0x1c8   : > { %v1872_v37 = vpop.f32.mrf.mxu1  ;;  %v1968_v19 = vpop.f32.mrf.mxu0 }
 0x1cb   : > { %1377 = vmatmul.msk.f32.gmra.mxu2 %vm478_vm2, %v462_v26  ;;  %1409 = vmatmul.msk.f32.gmra.mxu3 %vm478_vm2, %v462_v26  ;;  %v477_v26 = vpop.trf.xlu1 }
 0x1d0   : > { %v1876_v39 = vpop.f32.mrf.mxu1  ;;  %v1976_v23 = vpop.f32.mrf.mxu0 }
 0x1d3   : > { %1378 = vmatmul.msk.f32.gmra.mxu2 %vm478_vm2, %v463_v28  ;;  %1410 = vmatmul.msk.f32.gmra.mxu3 %vm478_vm2, %v463_v28 }
 0x1d8   : > { %v1882_v41 = vpop.f32.mrf.mxu1  ;;  %v1988_v29 = vpop.f32.mrf.mxu0 }
 0x1db   : > { %1379 = vmatmul.msk.f32.gmra.mxu2 %vm478_vm2, %v464_v30  ;;  %1411 = vmatmul.msk.f32.gmra.mxu3 %vm478_vm2, %v464_v30 }
 0x1e0   : > { %v1888_v44 = vpop.f32.mrf.mxu1 }
 0x1e3   : > { %1380 = vmatmul.msk.f32.gmra.mxu2 %vm478_vm2, %v465_v32  ;;  %1412 = vmatmul.msk.f32.gmra.mxu3 %vm478_vm2, %v465_v32  ;;  %v1994_v32 = vpop.f32.mrf.mxu0 }
 0x1e8   : > { %v1894_v47 = vpop.f32.mrf.mxu1 }
 0x1eb   : > { %1381 = vmatmul.msk.f32.gmra.mxu2 %vm478_vm2, %v466_v33  ;;  %1413 = vmatmul.msk.f32.gmra.mxu3 %vm478_vm2, %v466_v33 }
 0x1f0   : > { %v1902_v51 = vpop.f32.mrf.mxu1 }
 0x1f3   : > { %1382 = vmatmul.msk.f32.gmra.mxu2 %vm478_vm2, %v467_v34  ;;  %1414 = vmatmul.msk.f32.gmra.mxu3 %vm478_vm2, %v467_v34 }
 0x1f8   : > { %v1912_v55 = vpop.f32.mrf.mxu1 }
 0x1fb   : > { %1383 = vmatmul.msk.f32.gmra.mxu2 %vm478_vm2, %v468_v35  ;;  %1415 = vmatmul.msk.f32.gmra.mxu3 %vm478_vm2, %v468_v35  ;;  %v2000_v35 = vpop.f32.mrf.mxu0 }
 0x200   : > { %v1922_v60 = vpop.f32.mrf.mxu1 }
 0x203   : > { %1384 = vmatmul.msk.f32.gmra.mxu2 %vm478_vm2, %v469_v36  ;;  %1416 = vmatmul.msk.f32.gmra.mxu3 %vm478_vm2, %v469_v36 }
 0x208   : > { %v1934_v2 = vpop.f32.mrf.mxu1 }
 0x20b   : > { %1385 = vmatmul.msk.f32.gmra.mxu2 %vm478_vm2, %v470_v38  ;;  %1417 = vmatmul.msk.f32.gmra.mxu3 %vm478_vm2, %v470_v38 }
 0x210   : > { %v1942_v6 = vpop.f32.mrf.mxu1 }
 0x213   : > { %1386 = vmatmul.msk.f32.gmra.mxu2 %vm478_vm2, %v471_v40  ;;  %1418 = vmatmul.msk.f32.gmra.mxu3 %vm478_vm2, %v471_v40  ;;  %v2006_v40 = vpop.f32.mrf.mxu0 }
 0x216   : > { %v1886_v43 = vpop.f32.mrf.mxu2 }
 0x218   : > { %v1952_v11 = vpop.f32.mrf.mxu1 }
 0x21b   : > { %1387 = vmatmul.msk.f32.gmra.mxu2 %vm478_vm2, %v472_v42  ;;  %1419 = vmatmul.msk.f32.gmra.mxu3 %vm478_vm2, %v472_v42 }
 0x21e   : > { %v1892_v46 = vpop.f32.mrf.mxu2 }
 0x21f   : > { %v831_v14 = vmax.f32 %v1892_v46, %v1952_v11 }
 0x223   : > { %1388 = vmatmul.msk.f32.gmra.mxu2 %vm478_vm2, %v473_v45  ;;  %1420 = vmatmul.msk.f32.gmra.mxu3 %vm478_vm2, %v473_v45 }
 0x226   : > { %v1898_v49 = vpop.f32.mrf.mxu2  ;;  %v1900_v50 = vpop.f32.mrf.mxu3 }
 0x227   : > { %v834_v9 = vmax.f32 %v1898_v49, %v1900_v50 }
 0x22b   : > { %1389 = vmatmul.msk.f32.gmra.mxu2 %vm478_vm2, %v474_v48  ;;  %1421 = vmatmul.msk.f32.gmra.mxu3 %vm478_vm2, %v474_v48 }
 0x22e   : > { %v1906_v52 = vpop.f32.mrf.mxu2  ;;  %v1908_v53 = vpop.f32.mrf.mxu3 }
 0x22f   : > { %v837_v5 = vmax.f32 %v1906_v52, %v1908_v53 }
 0x233   : > { %1390 = vmatmul.msk.f32.gmra.mxu2 %vm478_vm2, %v475_v54  ;;  %1422 = vmatmul.msk.f32.gmra.mxu3 %vm478_vm2, %v475_v54 }
 0x236   : > { %v1914_v56 = vpop.f32.mrf.mxu2  ;;  %v1916_v57 = vpop.f32.mrf.mxu3 }
 0x237   : > { %v840_v0 = vmax.f32 %v1914_v56, %v1916_v57 }
 0x23b   : > { %1391 = vmatmul.msk.f32.gmra.mxu2 %vm478_vm2, %v476_v22  ;;  %1423 = vmatmul.msk.f32.gmra.mxu3 %vm478_vm2, %v476_v22 }
 0x23e   : > { %v1918_v58 = vpop.f32.mrf.mxu2  ;;  %v1920_v59 = vpop.f32.mrf.mxu3 }
 0x23f   : > { %v843_v61 = vmax.f32 %v1918_v58, %v1920_v59 }
 0x241   : > { %844 = vmax.xlane.f32.xlu2 %v843_v61 }
 0x243   : > { %1392 = vmatmul.msk.f32.gmra.mxu2 %vm478_vm2, %v477_v26  ;;  %1424 = vmatmul.msk.f32.gmra.mxu3 %vm478_vm2, %v477_v26 }
 0x246   : > { %v1926_v62 = vpop.f32.mrf.mxu2  ;;  %v1928_v63 = vpop.f32.mrf.mxu3 }
 0x247   : > { %v846_v1 = vmax.f32 %v1926_v62, %v1928_v63 }
 0x249   : > { %841 = vmax.xlane.f32.xlu2 %v840_v0  ;;  %847 = vmax.xlane.f32.xlu1 %v846_v1  ;;  %v2018_v0 = vpop.f32.mrf.mxu0 }
 0x24e   : > { %v1936_v3 = vpop.f32.mrf.mxu2  ;;  %v1938_v4 = vpop.f32.mrf.mxu3 }
 0x24f   : > { %2261 = vst [vmem:[#allocation6_spill] sm:$0xff] %v1936_v3 }
 0x250   : > { %2262 = vst [vmem:[#allocation7_spill] sm:$0xff] %v1938_v4 }
 0x251   : > { %838 = vmax.xlane.f32.xlu2 %v837_v5  ;;  %v2028_v22 = vpop.f32.mrf.mxu0 }
 0x256   : > { %v1944_v7 = vpop.f32.mrf.mxu2  ;;  %v1946_v8 = vpop.f32.mrf.mxu3 }
 0x257   : > { %2263 = vst [vmem:[#allocation8_spill] sm:$0xff] %v1944_v7  ;;  %v852_v10 = vmax.f32 %v1944_v7, %v1946_v8 }
 0x258   : > { %2264 = vst [vmem:[#allocation9_spill] sm:$0xff] %v1946_v8 }
 0x259   : > { %835 = vmax.xlane.f32.xlu2 %v834_v9  ;;  %853 = vmax.xlane.f32.xlu1 %v852_v10  ;;  %v828_v10 = vmax.f32 %v1886_v43, %v1942_v6 }
 0x25e   : > { %v1954_v12 = vpop.f32.mrf.mxu2  ;;  %v1956_v13 = vpop.f32.mrf.mxu3 }
 0x25f   : > { %2265 = vst [vmem:[#allocation10_spill] sm:$0xff] %v1954_v12 }
 0x261   : > { %832 = vmax.xlane.f32.xlu2 %v831_v14 }
 0x266   : > { %v1960_v15 = vpop.f32.mrf.mxu2  ;;  %v1962_v16 = vpop.f32.mrf.mxu3 }
 0x26e   : > { %v1964_v17 = vpop.f32.mrf.mxu2  ;;  %v1966_v18 = vpop.f32.mrf.mxu3 }
 0x276   : > { %v1970_v20 = vpop.f32.mrf.mxu2  ;;  %v1972_v21 = vpop.f32.mrf.mxu3 }
 0x27e   : > { %v1978_v24 = vpop.f32.mrf.mxu2  ;;  %v1980_v25 = vpop.f32.mrf.mxu3 }
 0x286   : > { %v1984_v27 = vpop.f32.mrf.mxu2  ;;  %v1986_v28 = vpop.f32.mrf.mxu3 }
 0x28e   : > { %v1990_v30 = vpop.f32.mrf.mxu2  ;;  %v1992_v31 = vpop.f32.mrf.mxu3 }
 0x296   : > { %v1996_v33 = vpop.f32.mrf.mxu2  ;;  %v1998_v34 = vpop.f32.mrf.mxu3 }
 0x29e   : > { %v2002_v36 = vpop.f32.mrf.mxu2  ;;  %v2004_v38 = vpop.f32.mrf.mxu3 }
 0x2a6   : > { %v2008_v42 = vpop.f32.mrf.mxu2  ;;  %v2010_v45 = vpop.f32.mrf.mxu3 }
 0x2a7   : > { %v882_v3 = vmax.f32 %v2008_v42, %v2010_v45 }
 0x2ae   : > { %v2012_v48 = vpop.f32.mrf.mxu2  ;;  %v2014_v54 = vpop.f32.mrf.mxu3 }
 0x2af   : > { %2266 = vst [vmem:[#allocation11_spill] sm:$0xff] %v2012_v48  ;;  %v885_v61 = vmax.f32 %v2012_v48, %v2014_v54 }
 0x2b0   : > { %2267 = vst [vmem:[#allocation12_spill] sm:$0xff] %v2014_v54 }
 0x2b1   : > { %886 = vmax.xlane.f32.xlu2 %v885_v61 }
 0x2b4   : > { %v845_v1 = vpop.xlane.xlu2 %844 }
 0x2b5   : > { %v925_v54 = vsub.f32 %v1918_v58, %v845_v1  ;;  %v926_v4 = vsub.f32 %v1920_v59, %v845_v1 }
 0x2b6   : > { %v2020_v5 = vpop.f32.mrf.mxu2  ;;  %v2022_v9 = vpop.f32.mrf.mxu3 }
 0x2b7   : > { %2268 = vst [vmem:[#allocation13_spill] sm:$0xff] %v2020_v5  ;;  %v888_v14 = vmax.f32 %v2020_v5, %v2022_v9  ;;  %v1019_v5 = vmul.f32 1.442695, %v926_v4 }
 0x2b8   : > { %2269 = vst [vmem:[#allocation14_spill] sm:$0xff] %v2022_v9  ;;  %v2037_v9 = vpop.f32.mrf.mxu0 }
 0x2b9   : > { %829 = vmax.xlane.f32.xlu2 %v828_v10  ;;  %889 = vmax.xlane.f32.xlu0 %v888_v14  ;;  %v1017_v10 = vmul.f32 1.442695, %v925_v54  ;;  %v825_v59 = vmax.f32 %v2037_v9, %v1934_v2 }
 0x2bc   : > { %v842_v26 = vpop.xlane.xlu2 %841  ;;  %v848_v8 = vpop.xlane.xlu1 %847 }
 0x2bd   : > { %v927_v7 = vsub.f32 %v1926_v62, %v848_v8  ;;  %v928_v61 = vsub.f32 %v1928_v63, %v848_v8  ;;  %v923_v14 = vsub.f32 %v1914_v56, %v842_v26  ;;  %v924_v62 = vsub.f32 %v1916_v57, %v842_v26 }
 0x2bf   : > { %v1021_v48 = vmul.f32 1.442695, %v927_v7  ;;  %v1023_v12 = vmul.f32 1.442695, %v928_v61  ;;  %v1013_v58 = vmul.f32 1.442695, %v923_v14  ;;  %v879_v61 = vmax.f32 %v2002_v36, %v2004_v38 }
 0x2c1   : > { %883 = vmax.xlane.f32.xlu2 %v882_v3  ;;  %1495 = vpow2.f32 %v1021_v48  ;;  %v1015_v3 = vmul.f32 1.442695, %v924_v62 }
 0x2c2   : > { %1497 = vpow2.f32 %v1023_v12 }
 0x2c3   : > { %1499 = vpow2.f32 %v1017_v10 }
 0x2c4   : > { %v839_v63 = vpop.xlane.xlu2 %838  ;;  %1501 = vpow2.f32 %v1019_v5 }
 0x2c5   : > { %v921_v7 = vsub.f32 %v1906_v52, %v839_v63  ;;  %v922_v8 = vsub.f32 %v1908_v53, %v839_v63  ;;  %1503 = vpow2.f32 %v1013_v58 }
 0x2c6   : > { %1505 = vpow2.f32 %v1015_v3 }
 0x2c7   : > { %v1496_v56 = vpop.eup %1495  ;;  %v1009_v4 = vmul.f32 1.442695, %v921_v7  ;;  %v1011_v57 = vmul.f32 1.442695, %v922_v8  ;;  %v822_v8 = vmax.f32 %v2028_v22, %v1922_v60 }
 0x2c8   : > { %v1498_v48 = vpop.eup %1497  ;;  %1089 = vmatpush.xpose.msra.mxu0 %v1496_v56 }
 0x2c9   : > { %826 = vmax.xlane.f32.xlu2 %v825_v59  ;;  %1109 = vmatpush.xpose.msra.mxu1 %v1498_v48  ;;  %v1500_v54 = vpop.eup %1499  ;;  %1507 = vpow2.f32 %v1009_v4  ;;  %v819_v4 = vmax.f32 %v2018_v0, %v1912_v55 }
 0x2ca   : > { %v1502_v26 = vpop.eup %1501  ;;  %1509 = vpow2.f32 %v1011_v57  ;;  %v873_v57 = vmax.f32 %v1990_v30, %v1992_v31 }
 0x2cb   : > { %v1504_v10 = vpop.eup %1503 }
 0x2cc   : > { %v836_v12 = vpop.xlane.xlu2 %835  ;;  %1090 = vmatpush.xpose.msra.mxu0 %v1500_v54  ;;  %v1506_v14 = vpop.eup %1505  ;;  %v870_v54 = vmax.f32 %v1984_v27, %v1986_v28 }
 0x2cd   : > { %v919_v52 = vsub.f32 %v1898_v49, %v836_v12  ;;  %v920_v1 = vsub.f32 %v1900_v50, %v836_v12  ;;  %1110 = vmatpush.xpose.msra.mxu1 %v1502_v26  ;;  %v816_v12 = vmax.f32 %v2006_v40, %v1902_v51  ;;  %v810_v26 = vmax.f32 %v1994_v32, %v1888_v44 }
 0x2cf   : > { %v1005_v5 = vmul.f32 1.442695, %v919_v52  ;;  %v1007_v53 = vmul.f32 1.442695, %v920_v1  ;;  %v1508_v62 = vpop.eup %1507  ;;  %v813_v52 = vmax.f32 %v2000_v35, %v1894_v47  ;;  %v867_v1 = vmax.f32 %v1978_v24, %v1980_v25 }
 0x2d0   : > { %1091 = vmatpush.xpose.msra.mxu0 %v1504_v10  ;;  %v1510_v58 = vpop.eup %1509 }
 0x2d1   : > { %1511 = vpow2.f32 %v1005_v5  ;;  %880 = vmax.xlane.f32.xlu2 %v879_v61  ;;  %1111 = vmatpush.xpose.msra.mxu1 %v1506_v14  ;;  %v2068_v5 = vpop.f32.mrf.mxu2 }
 0x2d2   : > { %1513 = vpow2.f32 %v1007_v53  ;;  %v2070_v53 = vpop.f32.mrf.mxu3 }
 0x2d3   : > { %v891_v61 = vmax.f32 %v2068_v5, %v2070_v53 }
 0x2d4   : > { %v833_v49 = vpop.xlane.xlu2 %832  ;;  %1092 = vmatpush.xpose.msra.mxu0 %v1508_v62 }
 0x2d5   : > { %v917_v50 = vsub.f32 %v1892_v46, %v833_v49  ;;  %v918_v63 = vsub.f32 %v1952_v11, %v833_v49  ;;  %1112 = vmatpush.xpose.msra.mxu1 %v1510_v58  ;;  %v876_v46 = vmax.f32 %v1996_v33, %v1998_v34 }
 0x2d7   : > { %v1512_v7 = vpop.eup %1511  ;;  %v1001_v59 = vmul.f32 1.442695, %v917_v50  ;;  %v1003_v3 = vmul.f32 1.442695, %v918_v63 }
 0x2d8   : > { %v1514_v56 = vpop.eup %1513  ;;  %1093 = vmatpush.xpose.msra.mxu0 %v1512_v7 }
 0x2d9   : > { %1515 = vpow2.f32 %v1001_v59  ;;  %823 = vmax.xlane.f32.xlu2 %v822_v8  ;;  %1113 = vmatpush.xpose.msra.mxu1 %v1514_v56  ;;  %v2074_v10 = vpop.f32.mrf.mxu2 }
 0x2da   : > { %1517 = vpow2.f32 %v1003_v3  ;;  %v2076_v14 = vpop.f32.mrf.mxu3  ;;  %v864_v3 = vmax.f32 %v1970_v20, %v1972_v21 }
 0x2db   : > { %v894_v62 = vmax.f32 %v2074_v10, %v2076_v14 }
 0x2df   : > { %v1516_v48 = vpop.eup %1515 }
 0x2e0   : > { %v1518_v11 = vpop.eup %1517  ;;  %1094 = vmatpush.xpose.msra.mxu0 %v1516_v48  ;;  %v807_v48 = vmax.f32 %v1988_v29, %v1882_v41 }
 0x2e1   : > { %1114 = vmatpush.xpose.msra.mxu1 %v1518_v11  ;;  %877 = vmax.xlane.f32.xlu2 %v876_v46 }
 0x2e9   : > { %820 = vmax.xlane.f32.xlu2 %v819_v4 }
 0x2f1   : > { %874 = vmax.xlane.f32.xlu2 %v873_v57 }
 0x2f9   : > { %817 = vmax.xlane.f32.xlu2 %v816_v12  ;;  %v861_v12 = vmax.f32 %v1964_v17, %v1966_v18 }
 0x301   : > { %871 = vmax.xlane.f32.xlu2 %v870_v54 }
 0x309   : > { %814 = vmax.xlane.f32.xlu2 %v813_v52 }
 0x311   : > { %868 = vmax.xlane.f32.xlu2 %v867_v1  ;;  %v804_v1 = vmax.f32 %v1976_v23, %v1876_v39 }
 0x319   : > { %811 = vmax.xlane.f32.xlu2 %v810_v26 }
 0x321   : > { %892 = vmax.xlane.f32.xlu2 %v891_v61 }
 0x324   : > { %v2078_v49 = vpop.xlane.xlu2 %886 }
 0x329   : > { %895 = vmax.xlane.f32.xlu2 %v894_v62 }
 0x32c   : > { %v830_v50 = vpop.xlane.xlu2 %829 }
 0x32d   : > { %v915_v63 = vsub.f32 %v1886_v43, %v830_v50  ;;  %v916_v58 = vsub.f32 %v1942_v6, %v830_v50 }
 0x32f   : > { %v997_v7 = vmul.f32 1.442695, %v915_v63  ;;  %v999_v59 = vmul.f32 1.442695, %v916_v58  ;;  %v858_v63 = vmax.f32 %v1960_v15, %v1962_v16 }
 0x331   : > { %1519 = vpow2.f32 %v997_v7  ;;  %865 = vmax.xlane.f32.xlu2 %v864_v3 }
 0x332   : > { %1521 = vpow2.f32 %v999_v59  ;;  %v801_v59 = vmax.f32 %v1968_v19, %v1872_v37 }
 0x334   : > { %v2086_v8 = vpop.xlane.xlu2 %883 }
 0x337   : > { %v1520_v56 = vpop.eup %1519 }
 0x338   : > { %v1522_v46 = vpop.eup %1521  ;;  %1095 = vmatpush.xpose.msra.mxu0 %v1520_v56 }
 0x339   : > { %1115 = vmatpush.xpose.msra.mxu1 %v1522_v46  ;;  %808 = vmax.xlane.f32.xlu2 %v807_v48 }
 0x33c   : > { %v827_v43 = vpop.xlane.xlu2 %826 }
 0x33d   : > { %v913_v6 = vsub.f32 %v2037_v9, %v827_v43  ;;  %v914_v11 = vsub.f32 %v1934_v2, %v827_v43  ;;  %v2270_v43 = vld [vmem:[#allocation10_spill] sm:$0xff] }
 0x33f   : > { %v993_v4 = vmul.f32 1.442695, %v913_v6  ;;  %v995_v57 = vmul.f32 1.442695, %v914_v11  ;;  %v855_v6 = vmax.f32 %v2270_v43, %v1956_v13 }
 0x341   : > { %1523 = vpow2.f32 %v993_v4  ;;  %862 = vmax.xlane.f32.xlu2 %v861_v12  ;;  %v2272_v12 = vld [vmem:[#allocation6_spill] sm:$0xff] }
 0x342   : > { %1525 = vpow2.f32 %v995_v57  ;;  %v2271_v57 = vld [vmem:[#allocation7_spill] sm:$0xff] }
 0x344   : > { %v2094_v54 = vpop.xlane.xlu2 %880 }
 0x347   : > { %v1524_v52 = vpop.eup %1523 }
 0x348   : > { %v1526_v26 = vpop.eup %1525  ;;  %1096 = vmatpush.xpose.msra.mxu0 %v1524_v52  ;;  %v849_v52 = vmax.f32 %v2272_v12, %v2271_v57 }
 0x349   : > { %1116 = vmatpush.xpose.msra.mxu1 %v1526_v26  ;;  %805 = vmax.xlane.f32.xlu2 %v804_v1 }
 0x34c   : > { %v824_v9 = vpop.xlane.xlu2 %823 }
 0x34d   : > { %v911_v2 = vsub.f32 %v2028_v22, %v824_v9  ;;  %v912_v61 = vsub.f32 %v1922_v60, %v824_v9 }
 0x34f   : > { %v989_v62 = vmul.f32 1.442695, %v911_v2  ;;  %v991_v50 = vmul.f32 1.442695, %v912_v61 }
 0x351   : > { %1527 = vpow2.f32 %v989_v62  ;;  %859 = vmax.xlane.f32.xlu2 %v858_v63 }
 0x352   : > { %1529 = vpow2.f32 %v991_v50 }
 0x354   : > { %v2102_v58 = vpop.xlane.xlu2 %877 }
 0x357   : > { %v1528_v7 = vpop.eup %1527 }
 0x358   : > { %v1530_v3 = vpop.eup %1529  ;;  %1097 = vmatpush.xpose.msra.mxu0 %v1528_v7 }
 0x359   : > { %1117 = vmatpush.xpose.msra.mxu1 %v1530_v3  ;;  %802 = vmax.xlane.f32.xlu2 %v801_v59 }
 0x35c   : > { %v821_v22 = vpop.xlane.xlu2 %820 }
 0x35d   : > { %v909_v60 = vsub.f32 %v2018_v0, %v821_v22  ;;  %v910_v56 = vsub.f32 %v1912_v55, %v821_v22 }
 0x35f   : > { %v985_v48 = vmul.f32 1.442695, %v909_v60  ;;  %v987_v46 = vmul.f32 1.442695, %v910_v56 }
 0x361   : > { %1531 = vpow2.f32 %v985_v48  ;;  %856 = vmax.xlane.f32.xlu2 %v855_v6 }
 0x362   : > { %1533 = vpow2.f32 %v987_v46 }
 0x364   : > { %v2110_v11 = vpop.xlane.xlu2 %874 }
 0x367   : > { %v1532_v4 = vpop.eup %1531 }
 0x368   : > { %v1534_v1 = vpop.eup %1533  ;;  %1098 = vmatpush.xpose.msra.mxu0 %v1532_v4 }
 0x369   : > { %1118 = vmatpush.xpose.msra.mxu1 %v1534_v1  ;;  %850 = vmax.xlane.f32.xlu2 %v849_v52 }
 0x36c   : > { %v818_v0 = vpop.xlane.xlu2 %817 }
 0x36d   : > { %v907_v55 = vsub.f32 %v2006_v40, %v818_v0  ;;  %v908_v26 = vsub.f32 %v1902_v51, %v818_v0 }
 0x36f   : > { %v981_v9 = vmul.f32 1.442695, %v907_v55  ;;  %v983_v2 = vmul.f32 1.442695, %v908_v26 }
 0x371   : > { %1535 = vpow2.f32 %v981_v9 }
 0x372   : > { %1537 = vpow2.f32 %v983_v2 }
 0x374   : > { %v2116_v61 = vpop.xlane.xlu2 %871 }
 0x377   : > { %v1536_v62 = vpop.eup %1535 }
 0x378   : > { %v1538_v50 = vpop.eup %1537  ;;  %1099 = vmatpush.xpose.msra.mxu0 %v1536_v62 }
 0x379   : > { %1119 = vmatpush.xpose.msra.mxu1 %v1538_v50 }
 0x37c   : > { %v815_v63 = vpop.xlane.xlu2 %814 }
 0x37d   : > { %v905_v7 = vsub.f32 %v2000_v35, %v815_v63  ;;  %v906_v59 = vsub.f32 %v1894_v47, %v815_v63 }
 0x37f   : > { %v977_v3 = vmul.f32 1.442695, %v905_v7  ;;  %v979_v22 = vmul.f32 1.442695, %v906_v59 }
 0x381   : > { %1539 = vpow2.f32 %v977_v3 }
 0x382   : > { %1541 = vpow2.f32 %v979_v22 }
 0x384   : > { %v2120_v51 = vpop.xlane.xlu2 %868 }
 0x387   : > { %v1540_v40 = vpop.eup %1539 }
 0x388   : > { %v1542_v60 = vpop.eup %1541  ;;  %1100 = vmatpush.xpose.msra.mxu0 %v1540_v40 }
 0x389   : > { %1120 = vmatpush.xpose.msra.mxu1 %v1542_v60 }
 0x38c   : > { %v812_v56 = vpop.xlane.xlu2 %811 }
 0x38d   : > { %v903_v48 = vsub.f32 %v1994_v32, %v812_v56  ;;  %v904_v46 = vsub.f32 %v1888_v44, %v812_v56 }
 0x38f   : > { %v973_v6 = vmul.f32 1.442695, %v903_v48  ;;  %v975_v4 = vmul.f32 1.442695, %v904_v46 }
 0x391   : > { %1543 = vpow2.f32 %v973_v6 }
 0x392   : > { %1545 = vpow2.f32 %v975_v4  ;;  %v890_v4 = vpop.xlane.xlu0 %889 }
 0x394   : > { %v893_v47 = vpop.xlane.xlu2 %892 }
 0x395   : > { %v957_v6 = vsub.f32 %v2068_v5, %v893_v47  ;;  %v2275_v5 = vld [vmem:[#allocation11_spill] sm:$0xff] }
 0x397   : > { %v1544_v35 = vpop.eup %1543 }
 0x398   : > { %v1546_v52 = vpop.eup %1545  ;;  %1101 = vmatpush.xpose.msra.mxu0 %v1544_v35  ;;  %v958_v35 = vsub.f32 %v2070_v53, %v893_v47  ;;  %v2276_v47 = vld [vmem:[#allocation12_spill] sm:$0xff] }
 0x399   : > { %1121 = vmatpush.xpose.msra.mxu1 %v1546_v52 }
 0x39c   : > { %v896_v1 = vpop.xlane.xlu2 %895 }
 0x39d   : > { %v959_v60 = vsub.f32 %v2074_v10, %v896_v1  ;;  %v960_v56 = vsub.f32 %v2076_v14, %v896_v1  ;;  %v2273_v10 = vld [vmem:[#allocation13_spill] sm:$0xff]  ;;  %v1081_v14 = vmul.f32 1.442695, %v957_v6  ;;  %v2274_v1 = vld [vmem:[#allocation14_spill] sm:$0xff] }
 0x39f   : > { %v1085_v48 = vmul.f32 1.442695, %v959_v60  ;;  %v1087_v52 = vmul.f32 1.442695, %v960_v56 }
 0x3a4   : > { %v2124_v0 = vpop.xlane.xlu2 %865 }
 0x3ac   : > { %v809_v55 = vpop.xlane.xlu2 %808 }
 0x3ad   : > { %v901_v26 = vsub.f32 %v1988_v29, %v809_v55  ;;  %v902_v9 = vsub.f32 %v1882_v41, %v809_v55 }
 0x3af   : > { %v969_v32 = vmul.f32 1.442695, %v901_v26  ;;  %v971_v2 = vmul.f32 1.442695, %v902_v9  ;;  %v955_v9 = vsub.f32 %v2273_v10, %v890_v4 }
 0x3b1   : > { %1547 = vpow2.f32 %v969_v32  ;;  %v956_v32 = vsub.f32 %v2274_v1, %v890_v4  ;;  %v947_v4 = vsub.f32 %v1996_v33, %v2102_v58  ;;  %v946_v33 = vsub.f32 %v1992_v31, %v2110_v11 }
 0x3b2   : > { %1549 = vpow2.f32 %v971_v2  ;;  %v953_v2 = vsub.f32 %v2275_v5, %v2078_v49  ;;  %v941_v31 = vsub.f32 %v1978_v24, %v2120_v51  ;;  %v940_v24 = vsub.f32 %v1972_v21, %v2124_v0  ;;  %v1201_v21 = vld [vmem:[%s2247_s5] sm:$0xf] }
 0x3b3   : > { %1204 = vperm.xlu1 %1494, %v1201_v21  }
 0x3b4   : > { %v2128_v44 = vpop.xlane.xlu2 %862 }
 0x3b7   : > { %v1548_v62 = vpop.eup %1547 }
 0x3b8   : > { %v1550_v50 = vpop.eup %1549  ;;  %1102 = vmatpush.xpose.msra.mxu0 %v1548_v62  ;;  %v1077_v62 = vmul.f32 1.442695, %v955_v9 }
 0x3b9   : > { %1122 = vmatpush.xpose.msra.mxu1 %v1550_v50  ;;  %v954_v50 = vsub.f32 %v2276_v47, %v2078_v49  ;;  %v952_v49 = vsub.f32 %v2010_v45, %v2086_v8 }
 0x3bb   : > { %v1075_v60 = vmul.f32 1.442695, %v954_v50 }
 0x3bc   : > { %v806_v63 = vpop.xlane.xlu2 %805 }
 0x3bd   : > { %v899_v7 = vsub.f32 %v1976_v23, %v806_v63  ;;  %v900_v59 = vsub.f32 %v1876_v39, %v806_v63  ;;  %v1079_v63 = vmul.f32 1.442695, %v956_v32 }
 0x3bf   : > { %v965_v3 = vmul.f32 1.442695, %v899_v7  ;;  %v967_v22 = vmul.f32 1.442695, %v900_v59 }
 0x3c1   : > { %1551 = vpow2.f32 %v965_v3  ;;  %v1073_v3 = vmul.f32 1.442695, %v953_v2  ;;  %v1049_v2 = vmul.f32 1.442695, %v941_v31 }
 0x3c2   : > { %1553 = vpow2.f32 %v967_v22  ;;  %v951_v22 = vsub.f32 %v2008_v42, %v2086_v8  ;;  %v949_v42 = vsub.f32 %v2002_v36, %v2094_v54  ;;  %v948_v36 = vsub.f32 %v1998_v34, %v2102_v58 }
 0x3c3   : > { %1555 = vpow2.f32 %v1085_v48  ;;  %v943_v34 = vsub.f32 %v1984_v27, %v2116_v61  ;;  %v1059_v58 = vmul.f32 1.442695, %v946_v33  ;;  %v942_v27 = vsub.f32 %v1980_v25, %v2120_v51 }
 0x3c4   : > { %v2132_v41 = vpop.xlane.xlu2 %859  ;;  %v1065_v8 = vmul.f32 1.442695, %v949_v42  ;;  %v937_v25 = vsub.f32 %v1964_v17, %v2128_v44  ;;  %v1047_v51 = vmul.f32 1.442695, %v940_v24  ;;  %v2277_v42 = vld [vmem:[#allocation8_spill] sm:$0xff] }
 0x3c7   : > { %v1552_v29 = vpop.eup %1551 }
 0x3c8   : > { %v1554_v40 = vpop.eup %1553  ;;  %1103 = vmatpush.xpose.msra.mxu0 %v1552_v29  ;;  %v2153_v29 = vld [vmem:[%s347_s17] sm:$0x1f] }
 0x3c9   : > { %1123 = vmatpush.xpose.msra.mxu1 %v1554_v40  ;;  %v2155_v40 = vld [vmem:[%s347_s17 + $0x8] sm:$0x1f]  ;;  %s1643_s17 = scalar_lea.hbm %s1642_s16, 8 }
 0x3ca   : > { %p1644_p12 = scmp.ne.s32.totalorder %s1642_s16, %s1643_s17 }
 0x3cc   : > { %v803_v46 = vpop.xlane.xlu2 %802  ;;  %p1645_p13 = pnand %p1644_p12, %p1791_p4 }
 0x3cd   : > { %v897_v23 = vsub.f32 %v1968_v19, %v803_v46  ;;  %v898_v39 = vsub.f32 %v1872_v37, %v803_v46  ;;  %v1083_v19 = vmul.f32 1.442695, %v958_v35  ;;  %v1556_v37 = vpop.eup %1555  ;;  %v1069_v46 = vmul.f32 1.442695, %v951_v22 }
 0x3ce   : > { %p1646_p0 = pneg %p1645_p13 }
 0x3cf   : > { %v961_v55 = vmul.f32 1.442695, %v897_v23  ;;  %v963_v26 = vmul.f32 1.442695, %v898_v39  ;;  %v1071_v23 = vmul.f32 1.442695, %v952_v49  ;;  %v950_v39 = vsub.f32 %v2004_v38, %v2094_v54  ;;  %v854_v49 = vpop.xlane.xlu1 %853 }
 0x3d0   : > { %v945_v38 = vsub.f32 %v1990_v30, %v2110_v11  ;;  %v1063_v54 = vmul.f32 1.442695, %v948_v36  ;;  %v944_v30 = vsub.f32 %v1986_v28, %v2116_v61  ;;  %v939_v28 = vsub.f32 %v1970_v20, %v2124_v0 }
 0x3d1   : > { %1557 = vpow2.f32 %v961_v55  ;;  %v1067_v35 = vmul.f32 1.442695, %v950_v39  ;;  %v1051_v61 = vmul.f32 1.442695, %v942_v27  ;;  %v938_v20 = vsub.f32 %v1966_v18, %v2128_v44 }
 0x3d2   : > { %1559 = vpow2.f32 %v963_v26  ;;  %v1061_v26 = vmul.f32 1.442695, %v947_v4  ;;  %v1055_v11 = vmul.f32 1.442695, %v944_v30  ;;  %v1045_v47 = vmul.f32 1.442695, %v939_v28 }
 0x3d3   : > { %1561 = vpow2.f32 %v1087_v52  ;;  %v1041_v0 = vmul.f32 1.442695, %v937_v25  ;;  %v1043_v17 = vmul.f32 1.442695, %v938_v20  ;;  %v936_v18 = vsub.f32 %v1962_v16, %v2132_v41 }
 0x3d4   : > { %1563 = vpow2.f32 %v1081_v14  ;;  %v1057_v14 = vmul.f32 1.442695, %v945_v38 }
 0x3d5   : > { %1565 = vpow2.f32 %v1083_v19  ;;  %v1053_v19 = vmul.f32 1.442695, %v943_v34 }
 0x3d6   : > { %1567 = vpow2.f32 %v1077_v62 }
 0x3d7   : > { %v1558_v53 = vpop.eup %1557  ;;  %1569 = vpow2.f32 %v1079_v63 }
 0x3d8   : > { %v1560_v7 = vpop.eup %1559  ;;  %1104 = vmatpush.xpose.msra.mxu0 %v1558_v53  ;;  %1571 = vpow2.f32 %v1073_v3 }
 0x3d9   : > { %v1562_v59 = vpop.eup %1561  ;;  %1124 = vmatpush.xpose.msra.mxu1 %v1560_v7  ;;  %1573 = vpow2.f32 %v1075_v60  ;;  %v857_v7 = vpop.xlane.xlu2 %856 }
 0x3da   : > { %v1564_v56 = vpop.eup %1563  ;;  %1575 = vpow2.f32 %v1069_v46  ;;  %v933_v60 = vsub.f32 %v2270_v43, %v857_v7 }
 0x3db   : > { %1105 = vmatmul.f32.vlgmr.msra.gmra.mxu0 %v2153_v29  ;;  %v1566_v48 = vpop.eup %1565  ;;  %1577 = vpow2.f32 %v1071_v23  ;;  %v931_v23 = vsub.f32 %v2277_v42, %v854_v49 }
 0x3dc   : > { %1129 = vmatpush.xpose.msrb.mxu0 %v1556_v37  ;;  %1125 = vmatmul.f32.vlgmr.msra.gmra.mxu1 %v2155_v40  ;;  %v1568_v6 = vpop.eup %1567  ;;  %1579 = vpow2.f32 %v1065_v8  ;;  %v1033_v16 = vmul.f32 1.442695, %v933_v60 }
 0x3dd   : > { %1149 = vmatpush.xpose.msrb.mxu1 %v1562_v59  ;;  %v1570_v45 = vpop.eup %1569  ;;  %1581 = vpow2.f32 %v1067_v35  ;;  %v935_v59 = vsub.f32 %v1960_v15, %v2132_v41  ;;  %v934_v15 = vsub.f32 %v1956_v13, %v857_v7  ;;  %v2278_v41 = vld [vmem:[#allocation9_spill] sm:$0xff]  ;;  %v1029_v4 = vmul.f32 1.442695, %v931_v23 }
 0x3de   : > { %v1572_v52 = vpop.eup %1571  ;;  %1583 = vpow2.f32 %v1061_v26  ;;  %v932_v39 = vsub.f32 %v2278_v41, %v854_v49 }
 0x3df   : > { %v1574_v55 = vpop.eup %1573  ;;  %1585 = vpow2.f32 %v1063_v54  ;;  %v1037_v22 = vmul.f32 1.442695, %v935_v59 }
 0x3e0   : > { %1130 = vmatpush.xpose.msrb.mxu0 %v1564_v56  ;;  %v1576_v10 = vpop.eup %1575  ;;  %1587 = vpow2.f32 %v1057_v14  ;;  %v1039_v56 = vmul.f32 1.442695, %v936_v18  ;;  %v1031_v35 = vmul.f32 1.442695, %v932_v39 }
 0x3e1   : > { %1150 = vmatpush.xpose.msrb.mxu1 %v1566_v48  ;;  %v1578_v9 = vpop.eup %1577  ;;  %1589 = vpow2.f32 %v1059_v58 }
 0x3e2   : > { %v1580_v1 = vpop.eup %1579  ;;  %1591 = vpow2.f32 %v1053_v19 }
 0x3e3   : > { %v1582_v32 = vpop.eup %1581  ;;  %1593 = vpow2.f32 %v1055_v11 }
 0x3e4   : > { %1131 = vmatpush.xpose.msrb.mxu0 %v1568_v6  ;;  %v1584_v37 = vpop.eup %1583  ;;  %1595 = vpow2.f32 %v1049_v2  ;;  %v1035_v6 = vmul.f32 1.442695, %v934_v15 }
 0x3e5   : > { %1151 = vmatpush.xpose.msrb.mxu1 %v1570_v45  ;;  %v1586_v5 = vpop.eup %1585  ;;  %1597 = vpow2.f32 %v1051_v61  ;;  %v851_v45 = vpop.xlane.xlu2 %850 }
 0x3e6   : > { %v1588_v62 = vpop.eup %1587  ;;  %1599 = vpow2.f32 %v1045_v47  ;;  %v929_v13 = vsub.f32 %v2272_v12, %v851_v45  ;;  %v930_v36 = vsub.f32 %v2271_v57, %v851_v45 }
 0x3e7   : > { %v1590_v53 = vpop.eup %1589  ;;  %1601 = vpow2.f32 %v1047_v51 }
 0x3e8   : > { %1132 = vmatpush.xpose.msrb.mxu0 %v1572_v52  ;;  %v1592_v50 = vpop.eup %1591  ;;  %1603 = vpow2.f32 %v1041_v0  ;;  %v1025_v26 = vmul.f32 1.442695, %v929_v13  ;;  %v1027_v38 = vmul.f32 1.442695, %v930_v36 }
 0x3e9   : > { %1152 = vmatpush.xpose.msrb.mxu1 %v1574_v55  ;;  %v1594_v63 = vpop.eup %1593  ;;  %1605 = vpow2.f32 %v1043_v17 }
 0x3ea   : > { %v1596_v44 = vpop.eup %1595  ;;  %1607 = vpow2.f32 %v1037_v22  ;;  %v1215_v22 = vld.sshfl [vmem:[#allocation1 + $0x8] sm:$0xff pattern:$0x75316420] }
 0x3eb   : > { %v1598_v3 = vpop.eup %1597  ;;  %1609 = vpow2.f32 %v1039_v56  ;;  %v1214_v56 = vld.sshfl [vmem:[#allocation1] sm:$0xff pattern:$0x75316420] }
 0x3ec   : > { %1133 = vmatpush.xpose.msrb.mxu0 %v1576_v10  ;;  %v1600_v48 = vpop.eup %1599  ;;  %1611 = vpow2.f32 %v1033_v16 }
 0x3ed   : > { %1153 = vmatpush.xpose.msrb.mxu1 %v1578_v9  ;;  %v1602_v46 = vpop.eup %1601  ;;  %1613 = vpow2.f32 %v1035_v6 }
 0x3ee   : > { %v1604_v43 = vpop.eup %1603  ;;  %1615 = vpow2.f32 %v1029_v4 }
 0x3ef   : > { %v1606_v8 = vpop.eup %1605  ;;  %1617 = vpow2.f32 %v1031_v35 }
 0x3f0   : > { %1134 = vmatpush.xpose.msrb.mxu0 %v1580_v1  ;;  %v1608_v52 = vpop.eup %1607  ;;  %1619 = vpow2.f32 %v1025_v26 }
 0x3f1   : > { %1154 = vmatpush.xpose.msrb.mxu1 %v1582_v32  ;;  %v1610_v55 = vpop.eup %1609  ;;  %1621 = vpow2.f32 %v1027_v38 }
 0x3f2   : > { %v1612_v54 = vpop.eup %1611 }
 0x3f3   : > { %v1614_v33 = vpop.eup %1613 }
 0x3f4   : > { %1135 = vmatpush.xpose.msrb.mxu0 %v1584_v37  ;;  %v1616_v12 = vpop.eup %1615 }
 0x3f5   : > { %1155 = vmatpush.xpose.msrb.mxu1 %v1586_v5  ;;  %v1618_v10 = vpop.eup %1617 }
 0x3f6   : > { %v1620_v9 = vpop.eup %1619 }
 0x3f7   : > { %v1622_v57 = vpop.eup %1621 }
 0x3f8   : > { %1136 = vmatpush.xpose.msrb.mxu0 %v1588_v62 }
 0x3f9   : > { %1156 = vmatpush.xpose.msrb.mxu1 %v1590_v53 }
 0x3fc   : > { %1137 = vmatpush.xpose.msrb.mxu0 %v1592_v50 }
 0x3fd   : > { %1157 = vmatpush.xpose.msrb.mxu1 %v1594_v63 }
 0x400   : > { %1138 = vmatpush.xpose.msrb.mxu0 %v1596_v44  ;;  %v1210_v44 = vstv %s1209_s20  ;;  %s1647_s20 = scalar_lea.hbm %s2249_s7, 16 }
 0x401   : > { %1158 = vmatpush.xpose.msrb.mxu1 %v1598_v3  ;;  %p1649_p2 = scmp.lt.s32.totalorder %s1647_s20, %s1643_s17 }
 0x403   : > { %p1650_p3 = por %p1649_p2, %p1648_p1 }
 0x404   : > { %1139 = vmatpush.xpose.msrb.mxu0 %v1600_v48 }
 0x405   : > { %1159 = vmatpush.xpose.msrb.mxu1 %v1602_v46  ;;  %p1651_p5 = pnand %p1650_p3, %p1646_p0 }
 0x408   : > { %1140 = vmatpush.xpose.msrb.mxu0 %v1604_v43 }
 0x409   : > { %1160 = vmatpush.xpose.msrb.mxu1 %v1606_v8 }
 0x40c   : > { %1141 = vmatpush.xpose.msrb.mxu0 %v1608_v52 }
 0x40d   : > { %1161 = vmatpush.xpose.msrb.mxu1 %v1610_v55 }
 0x410   : > { %1142 = vmatpush.xpose.msrb.mxu0 %v1612_v54 }
 0x411   : > { %1162 = vmatpush.xpose.msrb.mxu1 %v1614_v33 }
 0x414   : > { %1143 = vmatpush.xpose.msrb.mxu0 %v1616_v12 }
 0x415   : > { %1163 = vmatpush.xpose.msrb.mxu1 %v1618_v10 }
 0x418   : > { %1144 = vmatpush.xpose.msrb.mxu0 %v1620_v9 }
 0x419   : > { %1164 = vmatpush.xpose.msrb.mxu1 %v1622_v57 }
 0x41b   : > { %1145 = vmatmul.f32.vlgmr.msrb.gmra.mxu0 %v2153_v29 }
 0x41c   : > { %1165 = vmatmul.f32.vlgmr.msrb.gmra.mxu1 %v2155_v40 }
 0x425   : > { %v1205_v21 = vpop.permute.xlu1 %1204 }
 0x458   : > { %v1106_v14 = vpop.f32.mrf.mxu0 }
 0x459   : > { %v1126_v34 = vpop.f32.mrf.mxu1 }
 0x45a   : > { %v1127_v58 = vadd.f32 %v1126_v34, %v1106_v14 }
 0x45c   : > { %1623 = vrcp.f32 %v1127_v58  ;;  %vm1174_vm3 = vweird.f32 %v1127_v58  ;;  %v1180_v37 = vand.u32 2147483648, %v1127_v58  ;;  %v1178_v2 = vand.u32 2147483647, %v1127_v58 }
 0x45e   : > { %v1181_v29 = vor.u32 1.1754944e-38, %v1180_v37  ;;  %vm1179_vm6 = vcmp.eq.f32.partialorder %v1178_v2, 8.507059e+37 }
 0x462   : > { %v1624_v30 = vpop.eup %1623 }
 0x463   : > { %v1170_v1 = vmul.f32 %v1624_v30, %v1127_v58  ;;  %vm1175_vm4 = vweird.f32 %v1624_v30 }
 0x464   : > { %vm1176_vm5 = vmor %vm1174_vm3, %vm1175_vm4 }
 0x465   : > { %v1171_v32 = vsub.f32 1.0, %v1170_v1 }
 0x467   : > { %v1172_v31 = vmul.f32 %v1624_v30, %v1171_v32 }
 0x469   : > { %v1173_v5 = vadd.f32 %v1624_v30, %v1172_v31 }
 0x46b   : > { %v1177_v40 = vsel %vm1176_vm5, %v1624_v30, %v1173_v5 }
 0x46c   : > { %v1182_v24 = vsel %vm1179_vm6, %v1181_v29, %v1177_v40 }
 0x46d   : > { %v1197_v47 = vperm.slane %v1182_v24, 4 }
 0x46f   : > { %v1199_v63 = vmul.f32 %v1197_v47, %v1127_v58 }
 0x471   : > { %v1207_v17 = vadd.f32 %v1205_v21, %v1199_v63 }
 0x473   : > { %v1211_v60 = vmul.f32 %v1210_v44, %v1207_v17 }
 0x475   : > { %v1218_v48 = vadd.f32 %v1214_v56, %v1211_v60 }
 0x498   : > { %v1146_v19 = vpop.f32.mrf.mxu0 }
 0x499   : > { %v1166_v11 = vpop.f32.mrf.mxu1 }
 0x49a   : > { %v1167_v27 = vadd.f32 %v1166_v11, %v1146_v19 }
 0x49c   : > { %1625 = vrcp.f32 %v1167_v27  ;;  %v1194_v53 = vand.u32 2147483648, %v1167_v27  ;;  %v1192_v51 = vand.u32 2147483647, %v1167_v27  ;;  %vm1188_vm8 = vweird.f32 %v1167_v27 }
 0x49e   : > { %v1195_v50 = vor.u32 1.1754944e-38, %v1194_v53  ;;  %vm1193_vm10 = vcmp.eq.f32.partialorder %v1192_v51, 8.507059e+37 }
 0x4a2   : > { %v1626_v28 = vpop.eup %1625 }
 0x4a3   : > { %v1184_v61 = vmul.f32 %v1626_v28, %v1167_v27  ;;  %vm1189_vm7 = vweird.f32 %v1626_v28 }
 0x4a4   : > { %vm1190_vm9 = vmor %vm1188_vm8, %vm1189_vm7 }
 0x4a5   : > { %v1185_v62 = vsub.f32 1.0, %v1184_v61 }
 0x4a7   : > { %v1186_v25 = vmul.f32 %v1626_v28, %v1185_v62 }
 0x4a9   : > { %v1187_v20 = vadd.f32 %v1626_v28, %v1186_v25 }
 0x4ab   : > { %v1191_v7 = vsel %vm1190_vm9, %v1626_v28, %v1187_v20 }
 0x4ac   : > { %v1196_v0 = vsel %vm1193_vm10, %v1195_v50, %v1191_v7 }
 0x4ad   : > { %v1198_v59 = vperm.slane %v1196_v0, 4 }
 0x4af   : > { %v1200_v18 = vmul.f32 %v1198_v59, %v1167_v27 }
 0x4b1   : > { %v1208_v3 = vadd.f32 %v1205_v21, %v1200_v18 }
 0x4b3   : > { %v1212_v49 = vmul.f32 %v1210_v44, %v1208_v3 }
 0x4b5   : > { %v1219_v15 = vadd.f32 %v1215_v22, %v1212_v49 }
 0x4b7   : > { %v1222_v46 = vrot.slane %v1219_v15, 4 }
 0x4b9   : > { %v1223_v42 = vsel %vm369_vm0, %v1218_v48, %v1222_v46 }
 0x4ba   : > { %1225 = vst [vmem:[%s327_s9] sm:$0xff] %v1223_v42 }
 0x4bb   : > { %1654 = shalt.err (!%p1651_p5)
}
 0x4bc   : > { %1436 = dma.vmem_to_hbm [thread:$0]  (%p1791_p4), %s1243_s11, 128, %s1245_s13, %s1227_s29  }
 0x4bd PF: > { %p1442_p6 = scmp.ge.s32.totalorder %s1705_s8, 2  ;;  %s1256_s21 = sand.u32 1, %s1685_s26  }
 0x4be   : > { %s1257_s24 = scalar_lea.sflag [#allocation4], %s1256_s21 }
 0x4bf   : > { %p1439_p7 = pnand %p1442_p6, %p1798_p8 }
 0x4c1   : > { %p1440_p9 = pneg %p1439_p7 }
 0x4c3   : > { %1680 = dma.done.wait (%p1440_p9), %s1257_s24, 128  }
 0x4c4   : > { %1682 = vsyncadd (%p1440_p9), %s1257_s24, 4294967168  ;;  %s21_s8 = sadd.s32 1, %s1705_s8   ;;  %s2279_s26 = smov %s1689_s27 }
 0x4c5   : > { %p18_p10 = scmp.ge.s32.totalorder %s21_s8, 4   ;;  %s2280_s27 = smov %s1693_s28 }
 0x4c6   : > { %s2281_s28 = smov %s1804_s15  ;;  %s2282_s29 = smov %s1701_s30 }
 0x4c7   : > { %s2283_s30 = smov %s2285_s10  ;;  %20 = sbr.rel (!%p18_p10) target bundleno = 6 (0x6), region = 89 }
 0x4cc   :  { %1263 = vsyncpa [#allocation4], 1 }
 0x4cd   :  { %1265 = vsyncpa [#allocation4 + $0x1], 1 }

</bundles_post_ra>
